<compile_context>
chip_gen: v6e
topology: v6e:2x2x1
jax: 0.10.0
libtpu: 0.0.40
codegen_flags: <defaults>
</compile_context>

<pallas_src>
import jax
import jax.numpy as jnp
from jax.experimental import pallas as pl
from jax.experimental.pallas import tpu as pltpu

KH = KW = 3

_GELU_C1 = 0.7978845608028654              # sqrt(2/pi)
_GELU_C2 = 0.044715 * 0.7978845608028654   # folded cubic coefficient


def _convt_gelu_kernel(xs_ref, w_ref, b_ref, o_ref):
    # xs_ref: (K, n*hw)      im2col stack, taps folded into contraction axis, lane-dense RHS
    # w_ref:  (cout, K)      flipped, block-diagonal grouped weights (K = KH*KW*Cin)
    # b_ref:  (cout, 1)
    # o_ref:  (n, cout, hw)  NCHW-flat output
    nb = o_ref.shape[0]
    hw = o_ref.shape[2]

    # Single fused 64x36x512 MXU matmul for both batch elements.
    v1 = jnp.dot(w_ref[...], xs_ref[...],
                 preferred_element_type=jnp.float32) + b_ref[...]

    # tanh-GELU epilogue on the full (cout, n*hw) slab.
    inner = v1 * (_GELU_C1 + _GELU_C2 * (v1 * v1))
    y = (0.5 * v1) * (jnp.tanh(inner) + 1.0)

    # Split the fused lane axis back into batch elements; both slices are 256-lane
    # aligned -> unmasked vst.
    for i in range(nb):  # static, n=2
        o_ref[i] = y[:, i * hw:(i + 1) * hw].astype(o_ref.dtype)


def make_correlation_weight(weight, groups):
    """Build the (Cout, K) correlation weight from ConvTranspose2d weights.

    weight: (Cin, Cout//groups, KH, KW). Depends only on the module parameters,
    so compute it once (outside the per-call path).
    """
    cin = weight.shape[0]
    cin_g = cin // groups
    cout_g = weight.shape[1]
    cout = cout_g * groups
    K = KH * KW * cin

    wflip = weight[:, :, ::-1, ::-1]                              # (Cin, Cout_g, KH, KW)
    wc = jnp.zeros((KH, KW, cin, cout), jnp.float32)
    for g in range(groups):
        blk = jnp.transpose(wflip[g * cin_g:(g + 1) * cin_g], (2, 3, 0, 1))
        wc = wc.at[:, :, g * cin_g:(g + 1) * cin_g,
                   g * cout_g:(g + 1) * cout_g].set(blk)
    # (cout, K): kernel computes out = W @ X with a single K=36 contraction.
    return jnp.transpose(wc.reshape(K, cout), (1, 0))


@jax.jit
def conv_transpose_gelu(x_nchw, wc, bias_col):
    """x_nchw: (N, Cin, H, W); wc: (Cout, KH*KW*Cin); bias_col: (Cout, 1)."""
    n, cin, h, w = x_nchw.shape
    cout = wc.shape[0]
    hw = h * w
    K = KH * KW * cin

    # im2col tap stack (jitted layout plumbing): pad by k-1-pad = 1, stack the 9 shifted
    # views along the contraction axis, fuse batch into the lane axis -> (K, n*hw).
    xp = jnp.pad(x_nchw, ((0, 0), (0, 0), (1, 1), (1, 1)))
    taps = []
    for i in range(KH):
        for j in range(KW):
            taps.append(xp[:, :, i:i + h, j:j + w].reshape(n, cin, hw))
    xs = jnp.concatenate(taps, axis=1)                            # (n, K, hw)
    xs = jnp.transpose(xs, (1, 0, 2)).reshape(K, n * hw)          # (K, n*hw)

    out = pl.pallas_call(
        _convt_gelu_kernel,
        out_shape=jax.ShapeDtypeStruct((n, cout, hw), jnp.float32),
        grid_spec=pltpu.PrefetchScalarGridSpec(
            num_scalar_prefetch=0,
            grid=(1,),  # single step: whole working set (<256 KiB) lives in VMEM
            in_specs=[
                pl.BlockSpec((K, n * hw), lambda i: (0, 0)),
                pl.BlockSpec((cout, K), lambda i: (0, 0)),
                pl.BlockSpec((cout, 1), lambda i: (0, 0)),
            ],
            out_specs=pl.BlockSpec((n, cout, hw), lambda i: (0, 0, 0)),
        ),
        compiler_params=pltpu.CompilerParams(
            dimension_semantics=("arbitrary",)),
    )(xs, wc, bias_col)

    # Output is already NCHW-flat; reshape is free (no data movement).
    return out.reshape(n, cout, h, w)


def ref_forward(x, weight, bias, groups):
    """Pure-JAX reference using the transposed-conv scatter definition."""
    n, cin, h, w = x.shape
    cin_g = cin // groups
    cout_g = weight.shape[1]
    pad = 1
    hf, wf = h + KH - 1, w + KW - 1
    ys = []
    for g in range(groups):
        xg = x[:, g * cin_g:(g + 1) * cin_g]
        wg = weight[g * cin_g:(g + 1) * cin_g]
        yg = jnp.zeros((n, cout_g, hf, wf), jnp.float32)
        for i in range(KH):
            for j in range(KW):
                contrib = jnp.einsum('nchw,co->nohw', xg, wg[:, :, i, j])
                yg = yg.at[:, :, i:i + h, j:j + w].add(contrib)
        ys.append(yg[:, :, pad:hf - pad, pad:wf - pad])
    v1 = jnp.concatenate(ys, axis=1) + bias[None, :, None, None]
    v2 = v1 * 0.5
    v3 = v1 * v1 * v1
    v4 = v3 * 0.044715
    v5 = v1 + v4
    v6 = v5 * 0.7978845608028654
    v7 = jnp.tanh(v6)
    v8 = v7 + 1.0
    return v2 * v8


if __name__ == "__main__":
    key = jax.random.PRNGKey(0)
    kx, kw, kb = jax.random.split(key, 3)

    n, cin, h, w = 2, 4, 16, 16
    groups = 2
    cout = 64
    cout_g = cout // groups

    x = jax.random.normal(kx, (n, cin, h, w), jnp.float32)
    weight = 0.1 * jax.random.normal(kw, (cin, cout_g, KH, KW), jnp.float32)
    bias = 0.1 * jax.random.normal(kb, (cout,), jnp.float32)

    # Weight prep depends only on the parameters -> done once, outside the jitted path.
    wc = jax.block_until_ready(make_correlation_weight(weight, groups))
    bias_col = bias.reshape(cout, 1)

    out = conv_transpose_gelu(x, wc, bias_col)
    out = jax.block_until_ready(out)

    ref = ref_forward(x, weight, bias, groups)
    assert out.shape == (n, cout, h, w), out.shape
    max_err = float(jnp.max(jnp.abs(out - ref)))
    assert max_err < 1e-4, f"max_err={max_err}"
    print("KERNEL_OK")
</pallas_src>

<mosaic_0001>
module attributes {stable_mosaic.version = 11 : i64} {
  func.func @_convt_gelu_kernel(%arg0: i32, %arg1: memref<36x512xf32, #tpu.memory_space<vmem>>, %arg2: memref<64x36xf32, #tpu.memory_space<vmem>>, %arg3: memref<64x1xf32, #tpu.memory_space<vmem>>, %arg4: memref<2x64x256xf32, #tpu.memory_space<vmem>>) attributes {dimension_semantics = [#tpu.dimension_semantics<arbitrary>], iteration_bounds = array<i64: 1>, scalar_prefetch = 0 : i64, scratch_operands = 0 : i64, tpu.core_type = #tpu.core_type<tc>, window_params = [{pipeline_mode = #tpu.pipeline_mode<synchronous>, transform_indices = @transform_0, window_bounds = array<i64: 36, 512>}, {pipeline_mode = #tpu.pipeline_mode<synchronous>, transform_indices = @transform_1, window_bounds = array<i64: 64, 36>}, {pipeline_mode = #tpu.pipeline_mode<synchronous>, transform_indices = @transform_2, window_bounds = array<i64: 64, 1>}, {pipeline_mode = #tpu.pipeline_mode<synchronous>, transform_indices = @transform_3, window_bounds = array<i64: 2, 64, 256>}]} {
    %c0 = arith.constant 0 : index
    %c0_0 = arith.constant 0 : index
    %0 = vector.load %arg2[%c0, %c0_0] : memref<64x36xf32, #tpu.memory_space<vmem>>, vector<64x36xf32>
    %c0_1 = arith.constant 0 : index
    %c0_2 = arith.constant 0 : index
    %1 = vector.load %arg1[%c0_1, %c0_2] : memref<36x512xf32, #tpu.memory_space<vmem>>, vector<36x512xf32>
    %cst = arith.constant dense<0.000000e+00> : vector<64x512xf32>
    %2 = tpu.matmul %0, %1, %cst {dimension_numbers = #tpu.dot_dimension_numbers<[1], [0], [0], [1], [0, 0, 1, 1], [], []>} : vector<64x36xf32>, vector<36x512xf32>, vector<64x512xf32> -> vector<64x512xf32>
    %c0_3 = arith.constant 0 : index
    %c0_4 = arith.constant 0 : index
    %3 = vector.load %arg3[%c0_3, %c0_4] : memref<64x1xf32, #tpu.memory_space<vmem>>, vector<64x1xf32>
    %4 = vector.broadcast %3 : vector<64x1xf32> to vector<64x512xf32>
    %5 = arith.addf %2, %4 : vector<64x512xf32>
    %6 = arith.mulf %5, %5 : vector<64x512xf32>
    %cst_5 = arith.constant 0.0356774069 : f32
    %7 = vector.broadcast %cst_5 : f32 to vector<64x512xf32>
    %8 = arith.mulf %7, %6 : vector<64x512xf32>
    %cst_6 = arith.constant 0.797884583 : f32
    %9 = vector.broadcast %cst_6 : f32 to vector<64x512xf32>
    %10 = arith.addf %9, %8 : vector<64x512xf32>
    %11 = arith.mulf %5, %10 : vector<64x512xf32>
    %cst_7 = arith.constant 5.000000e-01 : f32
    %12 = vector.broadcast %cst_7 : f32 to vector<64x512xf32>
    %13 = arith.mulf %12, %5 : vector<64x512xf32>
    %14 = math.tanh %11 : vector<64x512xf32>
    %cst_8 = arith.constant 1.000000e+00 : f32
    %15 = vector.broadcast %cst_8 : f32 to vector<64x512xf32>
    %16 = arith.addf %14, %15 : vector<64x512xf32>
    %17 = arith.mulf %13, %16 : vector<64x512xf32>
    %18 = vector.extract_strided_slice %17 {offsets = [0, 0], sizes = [64, 256], strides = [1, 1]} : vector<64x512xf32> to vector<64x256xf32>
    %c0_9 = arith.constant 0 : index
    %c0_10 = arith.constant 0 : index
    %c0_11 = arith.constant 0 : index
    %19 = vector.load %arg4[%c0_9, %c0_10, %c0_11] : memref<2x64x256xf32, #tpu.memory_space<vmem>>, vector<1x64x256xf32>
    %20 = vector.shape_cast %19 : vector<1x64x256xf32> to vector<64x256xf32>
    %21 = vector.shape_cast %18 : vector<64x256xf32> to vector<1x64x256xf32>
    tpu.vector_store %arg4[%c0_9, %c0_10, %c0_11], %21 {strides = array<i32>} : memref<2x64x256xf32, #tpu.memory_space<vmem>>, vector<1x64x256xf32>,
    %22 = vector.extract_strided_slice %17 {offsets = [0, 256], sizes = [64, 256], strides = [1, 1]} : vector<64x512xf32> to vector<64x256xf32>
    %c1 = arith.constant 1 : index
    %c0_12 = arith.constant 0 : index
    %c0_13 = arith.constant 0 : index
    %23 = vector.load %arg4[%c1, %c0_12, %c0_13] : memref<2x64x256xf32, #tpu.memory_space<vmem>>, vector<1x64x256xf32>
    %24 = vector.shape_cast %23 : vector<1x64x256xf32> to vector<64x256xf32>
    %25 = vector.shape_cast %22 : vector<64x256xf32> to vector<1x64x256xf32>
    tpu.vector_store %arg4[%c1, %c0_12, %c0_13], %25 {strides = array<i32>} : memref<2x64x256xf32, #tpu.memory_space<vmem>>, vector<1x64x256xf32>,
    return
  }
  func.func @transform_0(%arg0: i32) -> (i32, i32) {
    %c0_i32 = arith.constant 0 : i32
    %c0_i32_0 = arith.constant 0 : i32
    %c0_i32_1 = arith.constant 0 : i32
    return %c0_i32, %c0_i32_0 : i32, i32
  }
  func.func @transform_1(%arg0: i32) -> (i32, i32) {
    %c0_i32 = arith.constant 0 : i32
    %c0_i32_0 = arith.constant 0 : i32
    %c0_i32_1 = arith.constant 0 : i32
    return %c0_i32, %c0_i32_0 : i32, i32
  }
  func.func @transform_2(%arg0: i32) -> (i32, i32) {
    %c0_i32 = arith.constant 0 : i32
    %c0_i32_0 = arith.constant 0 : i32
    %c0_i32_1 = arith.constant 0 : i32
    return %c0_i32, %c0_i32_0 : i32, i32
  }
  func.func @transform_3(%arg0: i32) -> (i32, i32, i32) {
    %c0_i32 = arith.constant 0 : i32
    %c0_i32_0 = arith.constant 0 : i32
    %c0_i32_1 = arith.constant 0 : i32
    %c0_i32_2 = arith.constant 0 : i32
    return %c0_i32, %c0_i32_0, %c0_i32_1 : i32, i32, i32
  }
}

</mosaic_0001>

<bundles_post_ra>
// kernel: conv_transpose_gelu.1
= control target key start
LH: loop header
LB: loop body
LE: loop exit
PB: predicated region body
PF: predicated region fallthrough
CT: control target
= control target key end

     0   :  { %vm115_vm0 = vcmask 1043456   ;;  %v751_v3 = vmov 0.0   ;;  %vm90_vm1 = vcmask 293888   ;;  %v752_v25 = vmov 0   ;;  %s1189_s0 = inlined_call_operand.vmem [shape: f32[36,512], index: 0, kind: input, shape index: {}]   ;;  %s1190_s1 = inlined_call_operand.vmem [shape: f32[64,36], index: 1, kind: input, shape index: {}]   ;;  %s1191_s2 = inlined_call_operand.vmem [shape: f32[64,1], index: 2, kind: input, shape index: {}]   ;;  %s1192_s3 = inlined_call_operand.vmem [shape: f32[2,64,256], index: 3, kind: output, shape index: {}]  }
   0x1   :  { %v39_v0 = vld [vmem:[%s1189_s0 + $0x88] sm:$0xf]  ;;  %v41_v1 = vld [vmem:[%s1189_s0 + $0x98] sm:$0xf]  ;;  %v38_v2 = vld [vmem:[%s1189_s0 + $0x80] sm:$0xf]  ;;  %192 = vmatprep.mubr.f32.mxu0 %v751_v3  ;;  %305 = vmatprep.mubr.f32.mxu1 %v751_v3 }
   0x2   :  { %647 = vmatprep.subr.msk.mxu0 %vm115_vm0, %v39_v0  ;;  %657 = vmatprep.subr.msk.mxu1 %vm115_vm0, %v41_v1  ;;  %v40_v4 = vld [vmem:[%s1189_s0 + $0x90] sm:$0xf]  ;;  %v35_v5 = vld [vmem:[%s1189_s0 + $0x68] sm:$0xff]  ;;  %v37_v6 = vld [vmem:[%s1189_s0 + $0x78] sm:$0xff] }
   0x3   :  { %648 = vmatpush1.msk.msra.mxu0 %vm115_vm0, %v38_v2  ;;  %658 = vmatpush1.msk.msra.mxu1 %vm115_vm0, %v40_v4  ;;  %v34_v7 = vld [vmem:[%s1189_s0 + $0x60] sm:$0xff]  ;;  %v36_v8 = vld [vmem:[%s1189_s0 + $0x70] sm:$0xff]  ;;  %v31_v9 = vld [vmem:[%s1189_s0 + $0x48] sm:$0xff] }
   0x4   :  { %152 = vmatprep.subr.mxu0 %v35_v5  ;;  %265 = vmatprep.subr.mxu1 %v37_v6  ;;  %v33_v10 = vld [vmem:[%s1189_s0 + $0x58] sm:$0xff]  ;;  %v30_v11 = vld [vmem:[%s1189_s0 + $0x40] sm:$0xff]  ;;  %v32_v12 = vld [vmem:[%s1189_s0 + $0x50] sm:$0xff] }
   0x5   :  { %153 = vmatpush1.msra.mxu0 %v34_v7  ;;  %266 = vmatpush1.msra.mxu1 %v36_v8  ;;  %v27_v13 = vld [vmem:[%s1189_s0 + $0x28] sm:$0xff]  ;;  %v29_v14 = vld [vmem:[%s1189_s0 + $0x38] sm:$0xff]  ;;  %v26_v15 = vld [vmem:[%s1189_s0 + $0x20] sm:$0xff] }
   0x6   :  { %154 = vmatprep.subr.mxu0 %v31_v9  ;;  %267 = vmatprep.subr.mxu1 %v33_v10  ;;  %v28_v16 = vld [vmem:[%s1189_s0 + $0x30] sm:$0xff]  ;;  %v23_v17 = vld [vmem:[%s1189_s0 + $0x8] sm:$0xff]  ;;  %v25_v18 = vld [vmem:[%s1189_s0 + $0x18] sm:$0xff] }
   0x7   :  { %155 = vmatpush1.msra.mxu0 %v30_v11  ;;  %268 = vmatpush1.msra.mxu1 %v32_v12  ;;  %v22_v19 = vld [vmem:[%s1189_s0] sm:$0xff]  ;;  %v24_v20 = vld [vmem:[%s1189_s0 + $0x10] sm:$0xff]  ;;  %v15_v24 = vld [vmem:[%s1190_s1 + $0x8] sm:$0xff] }
   0x8   :  { %156 = vmatprep.subr.mxu0 %v27_v13  ;;  %269 = vmatprep.subr.mxu1 %v29_v14  ;;  %v14_v21 = vld [vmem:[%s1190_s1] sm:$0xff]  ;;  %v44_v23 = vld [vmem:[%s1191_s2 + $0x10] sm:$0xff]  ;;  %v43_v26 = vld [vmem:[%s1191_s2 + $0x8] sm:$0xff] }
   0x9   :  { %157 = vmatpush1.msra.mxu0 %v26_v15  ;;  %270 = vmatpush1.msra.mxu1 %v28_v16  ;;  %v42_v22 = vld [vmem:[%s1191_s2] sm:$0xff]  ;;  %v45_v27 = vld [vmem:[%s1191_s2 + $0x18] sm:$0xff]  ;;  %v16_v28 = vld [vmem:[%s1190_s1 + $0x10] sm:$0xff] }
   0xa   :  { %158 = vmatprep.subr.mxu0 %v23_v17  ;;  %271 = vmatprep.subr.mxu1 %v25_v18  ;;  %v47_v29 = vld [vmem:[%s1191_s2 + $0x28] sm:$0xff]  ;;  %v46_v30 = vld [vmem:[%s1191_s2 + $0x20] sm:$0xff]  ;;  %v17_v31 = vld [vmem:[%s1190_s1 + $0x18] sm:$0xff] }
   0xb   :  { %159 = vmatpush1.msra.mxu0 %v22_v19  ;;  %272 = vmatpush1.msra.mxu1 %v24_v20  ;;  %v49_v32 = vld [vmem:[%s1191_s2 + $0x38] sm:$0xff]  ;;  %v48_v33 = vld [vmem:[%s1191_s2 + $0x30] sm:$0xff]  ;;  %v18_v34 = vld [vmem:[%s1190_s1 + $0x20] sm:$0xff] }
   0xc   :  { %649 = vmatmul.mubr.msk.f32.vlgmr.msra.gmra.mxu0 %vm90_vm1, %v14_v21  ;;  %659 = vmatmul.mubr.msk.f32.vlgmr.msra.gmra.mxu1 %vm90_vm1, %v14_v21  ;;  %v19_v35 = vld [vmem:[%s1190_s1 + $0x28] sm:$0xff]  ;;  %v20_v36 = vld [vmem:[%s1190_s1 + $0x30] sm:$0xff]  ;;  %v21_v37 = vld [vmem:[%s1190_s1 + $0x38] sm:$0xff] }
   0xd   :  { %198 = vmatprep.mubr.f32.mxu0 %v751_v3  ;;  %311 = vmatprep.mubr.f32.mxu1 %v751_v3 }
   0xe   :  { %685 = vset.pattern.permute.xlu0 %v752_v25  ;;  %686 = vset.pattern.permute.xlu1 %v752_v25 }
   0xf   :  { %52 = vperm.xlu0 %685, %v42_v22   ;;  %62 = vperm.xlu1 %686, %v44_v23  }
  0x10   :  { %650 = vmatmul.mubr.msk.f32.gmra.mxu0 %vm90_vm1, %v15_v24  ;;  %660 = vmatmul.mubr.msk.f32.gmra.mxu1 %vm90_vm1, %v15_v24 }
  0x11   :  { %204 = vmatprep.mubr.f32.mxu0 %v751_v3  ;;  %317 = vmatprep.mubr.f32.mxu1 %v751_v3 }
  0x13   :  { %57 = vperm.xlu0 %685, %v43_v26   ;;  %67 = vperm.xlu1 %686, %v45_v27  }
  0x14   :  { %651 = vmatmul.mubr.msk.f32.gmra.mxu0 %vm90_vm1, %v16_v28  ;;  %661 = vmatmul.mubr.msk.f32.gmra.mxu1 %vm90_vm1, %v16_v28 }
  0x15   :  { %210 = vmatprep.mubr.f32.mxu0 %v751_v3  ;;  %323 = vmatprep.mubr.f32.mxu1 %v751_v3 }
  0x17   :  { %77 = vperm.xlu1 %686, %v47_v29   ;;  %72 = vperm.xlu0 %685, %v46_v30  }
  0x18   :  { %652 = vmatmul.mubr.msk.f32.gmra.mxu0 %vm90_vm1, %v17_v31  ;;  %662 = vmatmul.mubr.msk.f32.gmra.mxu1 %vm90_vm1, %v17_v31 }
  0x19   :  { %216 = vmatprep.mubr.f32.mxu0 %v751_v3  ;;  %329 = vmatprep.mubr.f32.mxu1 %v751_v3 }
  0x1b   :  { %87 = vperm.xlu1 %686, %v49_v32   ;;  %82 = vperm.xlu0 %685, %v48_v33  }
  0x1c   :  { %653 = vmatmul.mubr.msk.f32.gmra.mxu0 %vm90_vm1, %v18_v34  ;;  %663 = vmatmul.mubr.msk.f32.gmra.mxu1 %vm90_vm1, %v18_v34 }
  0x1d   :  { %222 = vmatprep.mubr.f32.mxu0 %v751_v3  ;;  %335 = vmatprep.mubr.f32.mxu1 %v751_v3 }
  0x20   :  { %654 = vmatmul.mubr.msk.f32.gmra.mxu0 %vm90_vm1, %v19_v35  ;;  %664 = vmatmul.mubr.msk.f32.gmra.mxu1 %vm90_vm1, %v19_v35 }
  0x21   :  { %228 = vmatprep.mubr.f32.mxu0 %v751_v3  ;;  %341 = vmatprep.mubr.f32.mxu1 %v751_v3 }
  0x24   :  { %655 = vmatmul.mubr.msk.f32.gmra.mxu0 %vm90_vm1, %v20_v36  ;;  %665 = vmatmul.mubr.msk.f32.gmra.mxu1 %vm90_vm1, %v20_v36 }
  0x25   :  { %234 = vmatprep.mubr.f32.mxu0 %v751_v3  ;;  %347 = vmatprep.mubr.f32.mxu1 %v751_v3 }
  0x28   :  { %656 = vmatmul.mubr.msk.f32.gmra.mxu0 %vm90_vm1, %v21_v37  ;;  %666 = vmatmul.mubr.msk.f32.gmra.mxu1 %vm90_vm1, %v21_v37 }
  0x8a   :  { %v53_v38 = vpop.permute.xlu0 %52  ;;  %v63_v17 = vpop.permute.xlu1 %62 }
  0x8e   :  { %v58_v43 = vpop.permute.xlu0 %57 }
  0xcc   :  { %v194_v39 = vpop.f32.mrf.mxu0  ;;  %v307_v40 = vpop.f32.mrf.mxu1 }
  0xcd   :  { %v195_v41 = vadd.f32 %v194_v39, %v53_v38  ;;  %v308_v42 = vadd.f32 %v307_v40, %v53_v38  ;;  %v68_v40 = vpop.permute.xlu1 %67 }
  0xce   :  { %v196_v44 = vpop.f32.mrf.mxu0  ;;  %v309_v45 = vpop.f32.mrf.mxu1 }
  0xcf   :  { %v354_v46 = vmul.f32 %v195_v41, %v195_v41  ;;  %v356_v47 = vmul.f32 %v308_v42, %v308_v42  ;;  %v197_v48 = vadd.f32 %v196_v44, %v53_v38  ;;  %v913_v49 = vadd.f32 %v309_v45, %v53_v38 }
  0xd0   :  { %v200_v50 = vpop.f32.mrf.mxu0  ;;  %v313_v51 = vpop.f32.mrf.mxu1  ;;  %v482_v29 = vmul.f32 0.5, %v195_v41  ;;  %v484_v33 = vmul.f32 0.5, %v308_v42 }
  0xd1   :  { %v386_v52 = vmul.f32 0.035677407, %v354_v46  ;;  %v388_v53 = vmul.f32 0.035677407, %v356_v47  ;;  %v915_v54 = vadd.f32 %v200_v50, %v58_v43  ;;  %v917_v55 = vadd.f32 %v313_v51, %v58_v43 }
  0xd2   :  { %v355_v56 = vmul.f32 %v197_v48, %v197_v48  ;;  %v357_v57 = vmul.f32 %v913_v49, %v913_v49  ;;  %v202_v58 = vpop.f32.mrf.mxu0  ;;  %v315_v59 = vpop.f32.mrf.mxu1  ;;  %v483_v37 = vmul.f32 0.5, %v197_v48 }
  0xd3   :  { %v418_v60 = vadd.f32 0.7978846, %v386_v52  ;;  %v420_v61 = vadd.f32 0.7978846, %v388_v53  ;;  %v358_v62 = vmul.f32 %v915_v54, %v915_v54  ;;  %v360_v1 = vmul.f32 %v917_v55, %v917_v55 }
  0xd4   :  { %v387_v63 = vmul.f32 0.035677407, %v355_v56  ;;  %v389_v0 = vmul.f32 0.035677407, %v357_v57  ;;  %v206_v2 = vpop.f32.mrf.mxu0  ;;  %v925_v6 = vadd.f32 %v202_v58, %v58_v43  ;;  %v319_v7 = vpop.f32.mrf.mxu1  ;;  %v927_v11 = vadd.f32 %v315_v59, %v58_v43 }
  0xd5   :  { %v450_v3 = vmul.f32 %v418_v60, %v195_v41  ;;  %v452_v4 = vmul.f32 %v420_v61, %v308_v42  ;;  %v390_v5 = vmul.f32 0.035677407, %v358_v62  ;;  %v392_v10 = vmul.f32 0.035677407, %v360_v1 }
  0xd6   :  { %v419_v8 = vadd.f32 0.7978846, %v387_v63  ;;  %v421_v9 = vadd.f32 0.7978846, %v389_v0  ;;  %v359_v13 = vmul.f32 %v925_v6, %v925_v6  ;;  %v208_v18 = vpop.f32.mrf.mxu0  ;;  %v361_v21 = vmul.f32 %v927_v11, %v927_v11  ;;  %v321_v22 = vpop.f32.mrf.mxu1 }
  0xd7   :  { %687 = vtanh.f32 %v450_v3  ;;  %v422_v12 = vadd.f32 0.7978846, %v390_v5  ;;  %v424_v16 = vadd.f32 0.7978846, %v392_v10  ;;  %v936_v24 = vadd.f32 %v206_v2, %v63_v17 }
  0xd8   :  { %689 = vtanh.f32 %v452_v4  ;;  %v451_v14 = vmul.f32 %v419_v8, %v197_v48  ;;  %v453_v15 = vmul.f32 %v421_v9, %v913_v49  ;;  %v391_v20 = vmul.f32 0.035677407, %v359_v13  ;;  %v212_v32 = vpop.f32.mrf.mxu0  ;;  %v325_v36 = vpop.f32.mrf.mxu1 }
  0xd9   :  { %v454_v19 = vmul.f32 %v422_v12, %v915_v54  ;;  %v456_v23 = vmul.f32 %v424_v16, %v917_v55  ;;  %v938_v25 = vadd.f32 %v319_v7, %v63_v17  ;;  %v393_v27 = vmul.f32 0.035677407, %v361_v21 }
  0xda   :  { %691 = vtanh.f32 %v451_v14  ;;  %v423_v26 = vadd.f32 0.7978846, %v391_v20  ;;  %v940_v28 = vadd.f32 %v208_v18, %v63_v17  ;;  %v362_v30 = vmul.f32 %v936_v24, %v936_v24  ;;  %v214_v53 = vpop.f32.mrf.mxu0  ;;  %v327_v56 = vpop.f32.mrf.mxu1 }
  0xdb   :  { %693 = vtanh.f32 %v453_v15  ;;  %v364_v31 = vmul.f32 %v938_v25, %v938_v25  ;;  %v425_v35 = vadd.f32 0.7978846, %v393_v27  ;;  %v950_v44 = vadd.f32 %v321_v22, %v63_v17 }
  0xdc   :  { %695 = vtanh.f32 %v454_v19  ;;  %v455_v34 = vmul.f32 %v423_v26, %v925_v6  ;;  %v394_v38 = vmul.f32 0.035677407, %v362_v30  ;;  %v363_v41 = vmul.f32 %v940_v28, %v940_v28  ;;  %v218_v10 = vpop.f32.mrf.mxu0  ;;  %v331_v12 = vpop.f32.mrf.mxu1 }
  0xdd   :  { %697 = vtanh.f32 %v456_v23  ;;  %v396_v39 = vmul.f32 0.035677407, %v364_v31  ;;  %v457_v43 = vmul.f32 %v425_v35, %v927_v11  ;;  %v952_v45 = vadd.f32 %v212_v32, %v68_v40 }
  0xde   :  { %699 = vtanh.f32 %v455_v34  ;;  %v426_v42 = vadd.f32 0.7978846, %v394_v38  ;;  %v395_v47 = vmul.f32 0.035677407, %v363_v41  ;;  %v954_v50 = vadd.f32 %v325_v36, %v68_v40  ;;  %v333_v34 = vpop.f32.mrf.mxu1  ;;  %v73_v38 = vpop.permute.xlu0 %72 }
  0xdf   :  { %v428_v46 = vadd.f32 0.7978846, %v396_v39  ;;  %v485_v48 = vmul.f32 0.5, %v913_v49  ;;  %701 = vtanh.f32 %v457_v43  ;;  %v365_v51 = vmul.f32 %v950_v44, %v950_v44 }
  0xe0   :  { %v366_v52 = vmul.f32 %v952_v45, %v952_v45  ;;  %v486_v57 = vmul.f32 0.5, %v915_v54  ;;  %v458_v58 = vmul.f32 %v426_v42, %v936_v24  ;;  %v427_v60 = vadd.f32 0.7978846, %v395_v47 }
  0xe1   :  { %v460_v59 = vmul.f32 %v428_v46, %v938_v25  ;;  %v488_v61 = vmul.f32 0.5, %v917_v55  ;;  %v397_v62 = vmul.f32 0.035677407, %v365_v51  ;;  %v368_v63 = vmul.f32 %v954_v50, %v954_v50 }
  0xe2   :  { %v398_v49 = vmul.f32 0.035677407, %v366_v52  ;;  %703 = vtanh.f32 %v458_v58  ;;  %v459_v1 = vmul.f32 %v427_v60, %v940_v28  ;;  %v968_v2 = vadd.f32 %v214_v53, %v68_v40 }
  0xe3   :  { %v970_v3 = vadd.f32 %v327_v56, %v68_v40  ;;  %705 = vtanh.f32 %v460_v59  ;;  %v429_v5 = vadd.f32 0.7978846, %v397_v62  ;;  %v400_v55 = vmul.f32 0.035677407, %v368_v63  ;;  %v337_v59 = vpop.f32.mrf.mxu1 }
  0xe4   :  { %v688_v0 = vpop.eup %687  ;;  %v430_v7 = vadd.f32 0.7978846, %v398_v49  ;;  %707 = vtanh.f32 %v459_v1  ;;  %v367_v9 = vmul.f32 %v968_v2, %v968_v2  ;;  %v487_v15 = vmul.f32 0.5, %v925_v6 }
  0xe5   :  { %v690_v54 = vpop.eup %689  ;;  %v546_v4 = vadd.f32 1.0, %v688_v0  ;;  %v461_v16 = vmul.f32 %v429_v5, %v950_v44  ;;  %v432_v21 = vadd.f32 0.7978846, %v400_v55  ;;  %v489_v27 = vmul.f32 0.5, %v927_v11 }
  0xe6   :  { %v548_v8 = vadd.f32 1.0, %v690_v54  ;;  %v462_v17 = vmul.f32 %v430_v7, %v952_v45  ;;  %v399_v22 = vmul.f32 0.035677407, %v367_v9  ;;  %v369_v6 = vmul.f32 %v970_v3, %v970_v3 }
  0xe7   :  { %v692_v13 = vpop.eup %691  ;;  %v578_v14 = vmul.f32 %v546_v4, %v482_v29  ;;  %709 = vtanh.f32 %v461_v16  ;;  %v464_v32 = vmul.f32 %v432_v21, %v954_v50  ;;  %v990_v43 = vadd.f32 %v218_v10, %v73_v38 }
  0xe8   :  { %v694_v18 = vpop.eup %693  ;;  %v580_v19 = vmul.f32 %v548_v8, %v484_v33  ;;  %v547_v20 = vadd.f32 1.0, %v692_v13  ;;  %711 = vtanh.f32 %v462_v17  ;;  %v220_v33 = vpop.f32.mrf.mxu0  ;;  %v431_v11 = vadd.f32 0.7978846, %v399_v22 }
  0xe9   :  { %v696_v23 = vpop.eup %695  ;;  %610 = vst [vmem:[%s1192_s3] sm:$0xff] %v578_v14  ;;  %v549_v26 = vadd.f32 1.0, %v694_v18  ;;  %v401_v39 = vmul.f32 0.035677407, %v369_v6  ;;  %713 = vtanh.f32 %v464_v32  ;;  %v490_v52 = vmul.f32 0.5, %v936_v24  ;;  %v1011_v24 = vpop.permute.xlu1 %77 }
  0xea   :  { %v698_v29 = vpop.eup %697  ;;  %667 = vst [vmem:[%s1192_s3 + $0x80] sm:$0xff] %v580_v19  ;;  %v579_v30 = vmul.f32 %v547_v20, %v483_v37  ;;  %v550_v31 = vadd.f32 1.0, %v696_v23  ;;  %v992_v37 = vadd.f32 %v331_v12, %v73_v38  ;;  %v463_v47 = vmul.f32 %v431_v11, %v968_v2  ;;  %v224_v58 = vpop.f32.mrf.mxu0 }
  0xeb   :  { %v581_v35 = vmul.f32 %v549_v26, %v485_v48  ;;  %v552_v36 = vadd.f32 1.0, %v698_v29  ;;  %v700_v40 = vpop.eup %699  ;;  %v433_v48 = vadd.f32 0.7978846, %v401_v39  ;;  %v492_v53 = vmul.f32 0.5, %v938_v25 }
  0xec   :  { %611 = vst [vmem:[%s1192_s3 + $0x8] sm:$0xff] %v579_v30  ;;  %v582_v41 = vmul.f32 %v550_v31, %v486_v57  ;;  %v551_v46 = vadd.f32 1.0, %v700_v40  ;;  %v702_v51 = vpop.eup %701  ;;  %v370_v56 = vmul.f32 %v990_v43, %v990_v43  ;;  %v372_v57 = vmul.f32 %v992_v37, %v992_v37  ;;  %v226_v17 = vpop.f32.mrf.mxu0 }
  0xed   :  { %668 = vst [vmem:[%s1192_s3 + $0x88] sm:$0xff] %v581_v35  ;;  %v584_v42 = vmul.f32 %v552_v36, %v488_v61  ;;  %v553_v61 = vadd.f32 1.0, %v702_v51  ;;  %715 = vtanh.f32 %v463_v47  ;;  %v465_v62 = vmul.f32 %v433_v48, %v970_v3 }
  0xee   :  { %612 = vst [vmem:[%s1192_s3 + $0x10] sm:$0xff] %v582_v41  ;;  %v583_v60 = vmul.f32 %v551_v46, %v487_v15  ;;  %v402_v25 = vmul.f32 0.035677407, %v370_v56  ;;  %v404_v49 = vmul.f32 0.035677407, %v372_v57  ;;  %v1013_v63 = vadd.f32 %v220_v33, %v73_v38  ;;  %v230_v35 = vpop.f32.mrf.mxu0 }
  0xef   :  { %669 = vst [vmem:[%s1192_s3 + $0x90] sm:$0xff] %v584_v42  ;;  %v1015_v0 = vadd.f32 %v333_v34, %v73_v38  ;;  %v704_v1 = vpop.eup %703  ;;  %v585_v54 = vmul.f32 %v553_v61, %v489_v27  ;;  %717 = vtanh.f32 %v465_v62  ;;  %v1021_v4 = vadd.f32 %v224_v58, %v1011_v24  ;;  %v339_v34 = vpop.f32.mrf.mxu1 }
  0xf0   :  { %613 = vst [vmem:[%s1192_s3 + $0x18] sm:$0xff] %v583_v60  ;;  %v1024_v5 = vadd.f32 %v337_v59, %v1011_v24  ;;  %v706_v7 = vpop.eup %705  ;;  %v554_v8 = vadd.f32 1.0, %v704_v1  ;;  %v434_v55 = vadd.f32 0.7978846, %v402_v25  ;;  %v436_v9 = vadd.f32 0.7978846, %v404_v49  ;;  %v232_v58 = vpop.f32.mrf.mxu0 }
  0xf1   :  { %v371_v10 = vmul.f32 %v1013_v63, %v1013_v63  ;;  %v708_v12 = vpop.eup %707  ;;  %670 = vst [vmem:[%s1192_s3 + $0x98] sm:$0xff] %v585_v54  ;;  %v556_v13 = vadd.f32 1.0, %v706_v7  ;;  %v491_v14 = vmul.f32 0.5, %v940_v28  ;;  %v493_v15 = vmul.f32 0.5, %v950_v44  ;;  %v343_v57 = vpop.f32.mrf.mxu1 }
  0xf2   :  { %v373_v16 = vmul.f32 %v1015_v0, %v1015_v0  ;;  %v586_v18 = vmul.f32 %v554_v8, %v490_v52  ;;  %v555_v19 = vadd.f32 1.0, %v708_v12  ;;  %v466_v20 = vmul.f32 %v434_v55, %v990_v43  ;;  %v83_v49 = vpop.permute.xlu0 %82 }
  0xf3   :  { %v468_v21 = vmul.f32 %v436_v9, %v992_v37  ;;  %v588_v22 = vmul.f32 %v556_v13, %v492_v53  ;;  %v403_v23 = vmul.f32 0.035677407, %v371_v10  ;;  %v374_v27 = vmul.f32 %v1021_v4, %v1021_v4  ;;  %v345_v12 = vpop.f32.mrf.mxu1 }
  0xf4   :  { %v405_v26 = vmul.f32 0.035677407, %v373_v16  ;;  %v710_v6 = vpop.eup %709  ;;  %614 = vst [vmem:[%s1192_s3 + $0x20] sm:$0xff] %v586_v18  ;;  %v587_v28 = vmul.f32 %v555_v19, %v491_v14  ;;  %v494_v44 = vmul.f32 0.5, %v952_v45  ;;  %719 = vtanh.f32 %v466_v20  ;;  %v236_v16 = vpop.f32.mrf.mxu0 }
  0xf5   :  { %v376_v29 = vmul.f32 %v1024_v5, %v1024_v5  ;;  %v712_v30 = vpop.eup %711  ;;  %671 = vst [vmem:[%s1192_s3 + $0xa0] sm:$0xff] %v588_v22  ;;  %v557_v31 = vadd.f32 1.0, %v710_v6  ;;  %721 = vtanh.f32 %v468_v21  ;;  %v435_v32 = vadd.f32 0.7978846, %v403_v23  ;;  %v1094_v21 = vpop.permute.xlu1 %87 }
  0xf6   :  { %v437_v33 = vadd.f32 0.7978846, %v405_v26  ;;  %615 = vst [vmem:[%s1192_s3 + $0x28] sm:$0xff] %v587_v28  ;;  %v558_v45 = vadd.f32 1.0, %v712_v30  ;;  %v496_v36 = vmul.f32 0.5, %v954_v50  ;;  %v714_v39 = vpop.eup %713  ;;  %v1055_v46 = vadd.f32 %v226_v17, %v1011_v24 }
  0xf7   :  { %v406_v38 = vmul.f32 0.035677407, %v374_v27  ;;  %v408_v11 = vmul.f32 0.035677407, %v376_v29  ;;  %v589_v40 = vmul.f32 %v557_v31, %v493_v15  ;;  %v467_v41 = vmul.f32 %v435_v32, %v1013_v63 }
  0xf8   :  { %v469_v42 = vmul.f32 %v437_v33, %v1015_v0  ;;  %v590_v47 = vmul.f32 %v558_v45, %v494_v44  ;;  %v560_v48 = vadd.f32 1.0, %v714_v39  ;;  %v495_v50 = vmul.f32 0.5, %v968_v2 }
  0xf9   :  { %v438_v51 = vadd.f32 0.7978846, %v406_v38  ;;  %v440_v52 = vadd.f32 0.7978846, %v408_v11  ;;  %672 = vst [vmem:[%s1192_s3 + $0xa8] sm:$0xff] %v589_v40  ;;  %723 = vtanh.f32 %v467_v41  ;;  %v375_v53 = vmul.f32 %v1055_v46, %v1055_v46  ;;  %v349_v38 = vpop.f32.mrf.mxu1 }
  0xfa   :  { %v1064_v56 = vadd.f32 %v339_v34, %v1011_v24  ;;  %v716_v59 = vpop.eup %715  ;;  %616 = vst [vmem:[%s1192_s3 + $0x30] sm:$0xff] %v590_v47  ;;  %v592_v60 = vmul.f32 %v560_v48, %v496_v36  ;;  %725 = vtanh.f32 %v469_v42  ;;  %v497_v25 = vmul.f32 0.5, %v970_v3 }
  0xfb   :  { %v470_v61 = vmul.f32 %v438_v51, %v1021_v4  ;;  %v472_v2 = vmul.f32 %v440_v52, %v1024_v5  ;;  %v559_v62 = vadd.f32 1.0, %v716_v59  ;;  %v407_v1 = vmul.f32 0.035677407, %v375_v53 }
  0xfc   :  { %v377_v24 = vmul.f32 %v1064_v56, %v1064_v56  ;;  %v718_v54 = vpop.eup %717  ;;  %673 = vst [vmem:[%s1192_s3 + $0xb0] sm:$0xff] %v592_v60  ;;  %v1077_v7 = vadd.f32 %v230_v35, %v83_v49  ;;  %v1079_v8 = vadd.f32 %v343_v57, %v83_v49  ;;  %v1081_v55 = vadd.f32 %v232_v58, %v83_v49 }
  0xfd   :  { %727 = vtanh.f32 %v470_v61  ;;  %v591_v9 = vmul.f32 %v559_v62, %v495_v50  ;;  %v561_v10 = vadd.f32 1.0, %v718_v54  ;;  %v439_v3 = vadd.f32 0.7978846, %v407_v1 }
  0xfe   :  { %729 = vtanh.f32 %v472_v2  ;;  %v409_v13 = vmul.f32 0.035677407, %v377_v24  ;;  %v378_v14 = vmul.f32 %v1077_v7, %v1077_v7  ;;  %v380_v15 = vmul.f32 %v1079_v8, %v1079_v8  ;;  %v351_v24 = vpop.f32.mrf.mxu1 }
  0xff   :  { %617 = vst [vmem:[%s1192_s3 + $0x38] sm:$0xff] %v591_v9  ;;  %v593_v17 = vmul.f32 %v561_v10, %v497_v25  ;;  %v498_v18 = vmul.f32 0.5, %v990_v43  ;;  %v471_v19 = vmul.f32 %v439_v3, %v1055_v46  ;;  %v379_v20 = vmul.f32 %v1081_v55, %v1081_v55 }
 0x100   :  { %v441_v22 = vadd.f32 0.7978846, %v409_v13  ;;  %v410_v23 = vmul.f32 0.035677407, %v378_v14  ;;  %v412_v26 = vmul.f32 0.035677407, %v380_v15  ;;  %v1096_v27 = vadd.f32 %v345_v12, %v83_v49 }
 0x101   :  { %v720_v6 = vpop.eup %719  ;;  %674 = vst [vmem:[%s1192_s3 + $0xb8] sm:$0xff] %v593_v17  ;;  %v500_v28 = vmul.f32 0.5, %v992_v37  ;;  %731 = vtanh.f32 %v471_v19  ;;  %v411_v43 = vmul.f32 0.035677407, %v379_v20  ;;  %v1103_v44 = vadd.f32 %v236_v16, %v1094_v21  ;;  %v238_v37 = vpop.f32.mrf.mxu0 }
 0x102   :  { %v722_v29 = vpop.eup %721  ;;  %v562_v30 = vadd.f32 1.0, %v720_v6  ;;  %v473_v31 = vmul.f32 %v441_v22, %v1064_v56  ;;  %v442_v32 = vadd.f32 0.7978846, %v410_v23  ;;  %v444_v33 = vadd.f32 0.7978846, %v412_v26 }
 0x103   :  { %v564_v34 = vadd.f32 1.0, %v722_v29  ;;  %v499_v35 = vmul.f32 0.5, %v1013_v63  ;;  %v443_v45 = vadd.f32 0.7978846, %v411_v43  ;;  %v381_v36 = vmul.f32 %v1096_v27, %v1096_v27 }
 0x104   :  { %v594_v11 = vmul.f32 %v562_v30, %v498_v18  ;;  %733 = vtanh.f32 %v473_v31  ;;  %v474_v39 = vmul.f32 %v442_v32, %v1077_v7  ;;  %v476_v40 = vmul.f32 %v444_v33, %v1079_v8 }
 0x105   :  { %v596_v41 = vmul.f32 %v564_v34, %v500_v28  ;;  %v475_v42 = vmul.f32 %v443_v45, %v1081_v55  ;;  %v413_v47 = vmul.f32 0.035677407, %v381_v36  ;;  %v382_v48 = vmul.f32 %v1103_v44, %v1103_v44 }
 0x106   :  { %v724_v63 = vpop.eup %723  ;;  %618 = vst [vmem:[%s1192_s3 + $0x40] sm:$0xff] %v594_v11  ;;  %v501_v51 = vmul.f32 0.5, %v1015_v0  ;;  %735 = vtanh.f32 %v474_v39  ;;  %v1119_v52 = vadd.f32 %v349_v38, %v1094_v21  ;;  %v1122_v50 = vadd.f32 %v238_v37, %v1094_v21 }
 0x107   :  { %v726_v53 = vpop.eup %725  ;;  %675 = vst [vmem:[%s1192_s3 + $0xc0] sm:$0xff] %v596_v41  ;;  %v563_v57 = vadd.f32 1.0, %v724_v63  ;;  %737 = vtanh.f32 %v476_v40  ;;  %v445_v58 = vadd.f32 0.7978846, %v413_v47  ;;  %v414_v59 = vmul.f32 0.035677407, %v382_v48 }
 0x108   :  { %v565_v60 = vadd.f32 1.0, %v726_v53  ;;  %v502_v61 = vmul.f32 0.5, %v1021_v4  ;;  %739 = vtanh.f32 %v475_v42  ;;  %v384_v0 = vmul.f32 %v1119_v52, %v1119_v52 }
 0x109   :  { %v595_v62 = vmul.f32 %v563_v57, %v499_v35  ;;  %v477_v25 = vmul.f32 %v445_v58, %v1096_v27  ;;  %v446_v49 = vadd.f32 0.7978846, %v414_v59  ;;  %v383_v1 = vmul.f32 %v1122_v50, %v1122_v50 }
 0x10a   :  { %v728_v2 = vpop.eup %727  ;;  %v597_v9 = vmul.f32 %v565_v60, %v501_v51  ;;  %v504_v3 = vmul.f32 0.5, %v1024_v5  ;;  %v416_v12 = vmul.f32 0.035677407, %v384_v0  ;;  %v352_v17 = vadd.f32 %v351_v24, %v1094_v21 }
 0x10b   :  { %v730_v54 = vpop.eup %729  ;;  %v566_v10 = vadd.f32 1.0, %v728_v2  ;;  %619 = vst [vmem:[%s1192_s3 + $0x48] sm:$0xff] %v595_v62  ;;  %741 = vtanh.f32 %v477_v25  ;;  %v478_v13 = vmul.f32 %v446_v49, %v1103_v44  ;;  %v415_v14 = vmul.f32 0.035677407, %v383_v1 }
 0x10c   :  { %v568_v4 = vadd.f32 1.0, %v730_v54  ;;  %676 = vst [vmem:[%s1192_s3 + $0xc8] sm:$0xff] %v597_v9  ;;  %v448_v16 = vadd.f32 0.7978846, %v416_v12  ;;  %v385_v22 = vmul.f32 %v352_v17, %v352_v17  ;;  %v503_v23 = vmul.f32 0.5, %v1055_v46 }
 0x10d   :  { %v598_v15 = vmul.f32 %v566_v10, %v502_v61  ;;  %743 = vtanh.f32 %v478_v13  ;;  %v447_v5 = vadd.f32 0.7978846, %v415_v14  ;;  %v505_v29 = vmul.f32 0.5, %v1064_v56 }
 0x10e   :  { %v600_v18 = vmul.f32 %v568_v4, %v504_v3  ;;  %v732_v19 = vpop.eup %731  ;;  %v480_v20 = vmul.f32 %v448_v16, %v1119_v52  ;;  %v417_v6 = vmul.f32 0.035677407, %v385_v22  ;;  %v506_v46 = vmul.f32 0.5, %v1077_v7 }
 0x10f   :  { %620 = vst [vmem:[%s1192_s3 + $0x50] sm:$0xff] %v598_v15  ;;  %v567_v26 = vadd.f32 1.0, %v732_v19  ;;  %v479_v21 = vmul.f32 %v447_v5, %v1122_v50  ;;  %v508_v38 = vmul.f32 0.5, %v1079_v8  ;;  %v507_v11 = vmul.f32 0.5, %v1081_v55 }
 0x110   :  { %677 = vst [vmem:[%s1192_s3 + $0xd0] sm:$0xff] %v600_v18  ;;  %745 = vtanh.f32 %v480_v20  ;;  %v449_v31 = vadd.f32 0.7978846, %v417_v6  ;;  %v509_v8 = vmul.f32 0.5, %v1096_v27  ;;  %v510_v48 = vmul.f32 0.5, %v1103_v44 }
 0x111   :  { %v734_v28 = vpop.eup %733  ;;  %v599_v43 = vmul.f32 %v567_v26, %v503_v23  ;;  %747 = vtanh.f32 %v479_v21  ;;  %v512_v58 = vmul.f32 0.5, %v1119_v52  ;;  %v511_v59 = vmul.f32 0.5, %v1122_v50 }
 0x112   :  { %v569_v30 = vadd.f32 1.0, %v734_v28  ;;  %v481_v45 = vmul.f32 %v449_v31, %v352_v17  ;;  %v513_v52 = vmul.f32 0.5, %v352_v17 }
 0x113   :  { %v736_v32 = vpop.eup %735  ;;  %621 = vst [vmem:[%s1192_s3 + $0x58] sm:$0xff] %v599_v43 }
 0x114   :  { %v738_v33 = vpop.eup %737  ;;  %v601_v34 = vmul.f32 %v569_v30, %v505_v29  ;;  %v570_v35 = vadd.f32 1.0, %v736_v32  ;;  %749 = vtanh.f32 %v481_v45 }
 0x115   :  { %v740_v36 = vpop.eup %739  ;;  %v572_v37 = vadd.f32 1.0, %v738_v33 }
 0x116   :  { %678 = vst [vmem:[%s1192_s3 + $0xd8] sm:$0xff] %v601_v34  ;;  %v602_v56 = vmul.f32 %v570_v35, %v506_v46  ;;  %v571_v39 = vadd.f32 1.0, %v740_v36 }
 0x117   :  { %v604_v40 = vmul.f32 %v572_v37, %v508_v38 }
 0x118   :  { %v742_v41 = vpop.eup %741  ;;  %622 = vst [vmem:[%s1192_s3 + $0x60] sm:$0xff] %v602_v56  ;;  %v603_v7 = vmul.f32 %v571_v39, %v507_v11 }
 0x119   :  { %679 = vst [vmem:[%s1192_s3 + $0xe0] sm:$0xff] %v604_v40  ;;  %v573_v42 = vadd.f32 1.0, %v742_v41 }
 0x11a   :  { %v744_v47 = vpop.eup %743  ;;  %623 = vst [vmem:[%s1192_s3 + $0x68] sm:$0xff] %v603_v7 }
 0x11b   :  { %v605_v55 = vmul.f32 %v573_v42, %v509_v8  ;;  %v574_v63 = vadd.f32 1.0, %v744_v47 }
 0x11d   :  { %v746_v51 = vpop.eup %745  ;;  %680 = vst [vmem:[%s1192_s3 + $0xe8] sm:$0xff] %v605_v55  ;;  %v606_v53 = vmul.f32 %v574_v63, %v510_v48 }
 0x11e   :  { %v748_v57 = vpop.eup %747  ;;  %v576_v27 = vadd.f32 1.0, %v746_v51 }
 0x11f   :  { %624 = vst [vmem:[%s1192_s3 + $0x70] sm:$0xff] %v606_v53  ;;  %v575_v60 = vadd.f32 1.0, %v748_v57 }
 0x120   :  { %v608_v61 = vmul.f32 %v576_v27, %v512_v58 }
 0x121   :  { %v607_v44 = vmul.f32 %v575_v60, %v511_v59  ;;  %v750_v0 = vpop.eup %749 }
 0x122   :  { %681 = vst [vmem:[%s1192_s3 + $0xf0] sm:$0xff] %v608_v61  ;;  %v577_v2 = vadd.f32 1.0, %v750_v0 }
 0x123   :  { %625 = vst [vmem:[%s1192_s3 + $0x78] sm:$0xff] %v607_v44 }
 0x124   :  { %v609_v62 = vmul.f32 %v577_v2, %v513_v52 }
 0x126   :  { %682 = vst [vmem:[%s1192_s3 + $0xf8] sm:$0xff] %v609_v62 }

</bundles_post_ra>
